<compile_context>
chip_gen: v7x
topology: tpu7x:2x2x1
jax: 0.10.0
libtpu: 0.0.40
codegen_flags: <defaults>
</compile_context>

<pallas_src>
import functools

import jax
import jax.numpy as jnp
from jax import lax
from jax.experimental import pallas as pl
from jax.experimental.pallas import tpu as pltpu

EPS = 1e-8


# --------------------------------------------------------------------------
# Kernel 1: column mean (tiled reduction over N, output resident in VMEM)
# --------------------------------------------------------------------------
def _mean_kernel(x_ref, mean_ref, *, inv_n):
    @pl.when(pl.program_id(0) == 0)
    def _():
        mean_ref[...] = jnp.zeros_like(mean_ref)

    x = x_ref[...].astype(jnp.float32)                       # (TM, D)
    mean_ref[...] += jnp.sum(x, axis=0, keepdims=True)       # fp32 accumulate

    @pl.when(pl.program_id(0) == pl.num_programs(0) - 1)
    def _():
        mean_ref[...] *= jnp.float32(inv_n)


# --------------------------------------------------------------------------
# Kernel 2: covariance (tiled reduction over N, fp32 DxD resident accumulator)
# --------------------------------------------------------------------------
def _cov_kernel(x_ref, mean_ref, cov_ref, *, inv_nm1):
    @pl.when(pl.program_id(0) == 0)
    def _():
        cov_ref[...] = jnp.zeros_like(cov_ref)

    xn = x_ref[...].astype(jnp.float32) - mean_ref[...]      # (TM, D)
    # xn.T @ xn without materializing a transpose: contract batch axis (0, 0).
    cov_ref[...] += lax.dot_general(
        xn, xn, (((0,), (0,)), ((), ())),
        preferred_element_type=jnp.float32)

    @pl.when(pl.program_id(0) == pl.num_programs(0) - 1)
    def _():
        cov_ref[...] *= jnp.float32(inv_nm1)


# --------------------------------------------------------------------------
# Kernel 3: apply the (host-built) ZCA matrix: out = (x - mean) @ zca
# --------------------------------------------------------------------------
def _apply_kernel(x_ref, mean_ref, zca_ref, out_ref):
    xn = x_ref[...].astype(jnp.float32) - mean_ref[...]      # (TM, D)
    out = jnp.dot(xn, zca_ref[...].astype(jnp.float32),
                  preferred_element_type=jnp.float32)        # (TM, D)
    out_ref[...] = out.astype(out_ref.dtype)


def _pick_row_tile(n):
    """Largest MXU/lane-friendly row tile that divides N (whole array as fallback)."""
    for t in (512, 256, 128):
        if n >= t and n % t == 0:
            return t
    return n


def whitening1d_zca(x: jax.Array, eps: float = EPS) -> jax.Array:
    """ZCA whitening of x (shape [N, D]), matching Whitening1dZCA.forward."""
    n, d = x.shape
    dtype = x.dtype
    itemsize = jnp.dtype(dtype).itemsize
    tm = _pick_row_tile(n)
    grid = (n // tm,)

    # --- Kernel 1: column mean (fp32) -------------------------------------
    mean = pl.pallas_call(
        functools.partial(_mean_kernel, inv_n=1.0 / n),
        out_shape=jax.ShapeDtypeStruct((1, d), jnp.float32),
        grid=grid,
        in_specs=[pl.BlockSpec((tm, d), lambda i: (i, 0))],
        out_specs=pl.BlockSpec((1, d), lambda i: (0, 0)),
        compiler_params=pltpu.CompilerParams(
            dimension_semantics=("arbitrary",)),
    )(x)

    # --- Kernel 2: covariance (fp32, tiled reduction over N) --------------
    f_cov = pl.pallas_call(
        functools.partial(_cov_kernel, inv_nm1=1.0 / (n - 1)),
        out_shape=jax.ShapeDtypeStruct((d, d), jnp.float32),
        grid=grid,
        in_specs=[pl.BlockSpec((tm, d), lambda i: (i, 0)),
                  pl.BlockSpec((1, d), lambda i: (0, 0))],
        out_specs=pl.BlockSpec((d, d), lambda i: (0, 0)),
        compiler_params=pltpu.CompilerParams(
            dimension_semantics=("arbitrary",)),
        cost_estimate=pl.CostEstimate(
            flops=2 * n * d * d, transcendentals=0,
            bytes_accessed=n * d * itemsize + d * d * 4),
    )(x, mean)

    # --- Host: eigh + tiny DxD ZCA-matrix build ----------------------------
    # TODO(synk): symmetric eigendecomposition has no Pallas equivalent; done
    # host-side with jnp.linalg.eigh on the fp32 covariance.
    eigvals, eigvecs = jnp.linalg.eigh(f_cov)                # fp32, like torch
    eigvals = eigvals.astype(dtype)                          # match reference dtype handling
    eigvecs = eigvecs.astype(dtype)
    inv_sqrt = lax.rsqrt(eigvals + jnp.asarray(eps, dtype))  # (D,)
    # V @ diag(s) @ V.T  ==  (V * s) @ V.T  — O(D^3) on a tiny DxD, built once.
    zca = (eigvecs * inv_sqrt[None, :]) @ eigvecs.T          # (D, D)

    # --- Kernel 3: tiled, parallel apply -----------------------------------
    out = pl.pallas_call(
        _apply_kernel,
        out_shape=jax.ShapeDtypeStruct((n, d), dtype),
        grid=grid,
        in_specs=[pl.BlockSpec((tm, d), lambda i: (i, 0)),
                  pl.BlockSpec((1, d), lambda i: (0, 0)),
                  pl.BlockSpec((d, d), lambda i: (0, 0))],
        out_specs=pl.BlockSpec((tm, d), lambda i: (i, 0)),
        compiler_params=pltpu.CompilerParams(
            dimension_semantics=("parallel",)),
        cost_estimate=pl.CostEstimate(
            flops=2 * n * d * d, transcendentals=0,
            bytes_accessed=2 * n * d * itemsize + d * d * itemsize),
    )(x, mean, zca)

    return out


def _reference(x: jax.Array, eps: float = EPS) -> jax.Array:
    """Plain-JAX reference mirroring the PyTorch forward."""
    xn = x - jnp.mean(x, axis=0, keepdims=True)
    f_cov = (xn.T @ xn) / (x.shape[0] - 1)
    w, v = jnp.linalg.eigh(f_cov.astype(jnp.float32))
    w = w.astype(x.dtype)
    v = v.astype(x.dtype)
    inv_sqrt = lax.rsqrt(w + eps)
    zca = (v * inv_sqrt[None, :]) @ v.T
    return xn @ zca


if __name__ == "__main__":
    key = jax.random.PRNGKey(0)
    # ZCA whitening needs a full-rank covariance, i.e. N > D (N=8, D=32 gave a
    # rank-7 cov -> rsqrt of ~0/negative eigenvalues -> NaN in kernel AND
    # reference).  Use batch=1024, hidden=256: well-conditioned, lane-dense,
    # and exercises the tiled grid (4 row-tiles of 256).
    N, D = 1024, 256
    x = jax.random.normal(key, (N, D), dtype=jnp.float32)

    out = jax.block_until_ready(whitening1d_zca(x))
    ref = jax.block_until_ready(_reference(x))

    assert out.shape == (N, D) and out.dtype == jnp.float32
    max_err = float(jnp.max(jnp.abs(out - ref)))
    assert jnp.allclose(out, ref, atol=2e-3, rtol=2e-3), max_err

    print("KERNEL_OK")
</pallas_src>

<mosaic_0001>
module attributes {stable_mosaic.version = 11 : i64} {
  func.func @_mean_kernel(%arg0: i32, %arg1: memref<512x256xf32, #tpu.memory_space<vmem>>, %arg2: memref<1x256xf32, #tpu.memory_space<vmem>>) attributes {dimension_semantics = [#tpu.dimension_semantics<arbitrary>], iteration_bounds = array<i64: 2>, scalar_prefetch = 0 : i64, scratch_operands = 0 : i64, tpu.core_type = #tpu.core_type<tc>, window_params = [{transform_indices = @transform_0, window_bounds = array<i64: 512, 256>}, {pipeline_mode = #tpu.pipeline_mode<synchronous>, transform_indices = @transform_1, window_bounds = array<i64: 1, 256>}]} {
    %c0_i32 = arith.constant 0 : i32
    %0 = arith.cmpi eq, %arg0, %c0_i32 : i32
    %1 = arith.extui %0 : i1 to i32
    %c0_i32_0 = arith.constant 0 : i32
    %2 = arith.cmpi ne, %1, %c0_i32_0 : i32
    scf.if %2 {
      %cst_7 = arith.constant 0.000000e+00 : f32
      %12 = vector.broadcast %cst_7 : f32 to vector<1x256xf32>
      %c0_8 = arith.constant 0 : index
      %c0_9 = arith.constant 0 : index
      %13 = vector.load %arg2[%c0_8, %c0_9] : memref<1x256xf32, #tpu.memory_space<vmem>>, vector<1x256xf32>
      tpu.vector_store %arg2[%c0_8, %c0_9], %12 {strides = array<i32>} : memref<1x256xf32, #tpu.memory_space<vmem>>, vector<1x256xf32>,
    } else {
    }
    %c0 = arith.constant 0 : index
    %c0_1 = arith.constant 0 : index
    %3 = vector.load %arg1[%c0, %c0_1] : memref<512x256xf32, #tpu.memory_space<vmem>>, vector<512x256xf32>
    %c0_2 = arith.constant 0 : index
    %c0_3 = arith.constant 0 : index
    %4 = vector.load %arg2[%c0_2, %c0_3] : memref<1x256xf32, #tpu.memory_space<vmem>>, vector<1x256xf32>
    %cst = arith.constant dense<0.000000e+00> : vector<256xf32>
    %5 = vector.multi_reduction <add>, %3, %cst [0] : vector<512x256xf32> to vector<256xf32>
    %6 = vector.shape_cast %5 : vector<256xf32> to vector<1x256xf32>
    %7 = arith.addf %4, %6 : vector<1x256xf32>
    %c0_4 = arith.constant 0 : index
    %c0_5 = arith.constant 0 : index
    %8 = vector.load %arg2[%c0_4, %c0_5] : memref<1x256xf32, #tpu.memory_space<vmem>>, vector<1x256xf32>
    tpu.vector_store %arg2[%c0_4, %c0_5], %7 {strides = array<i32>} : memref<1x256xf32, #tpu.memory_space<vmem>>, vector<1x256xf32>,
    %c1_i32 = arith.constant 1 : i32
    %9 = arith.cmpi eq, %arg0, %c1_i32 : i32
    %10 = arith.extui %9 : i1 to i32
    %c0_i32_6 = arith.constant 0 : i32
    %11 = arith.cmpi ne, %10, %c0_i32_6 : i32
    scf.if %11 {
      %c0_7 = arith.constant 0 : index
      %c0_8 = arith.constant 0 : index
      %12 = vector.load %arg2[%c0_7, %c0_8] : memref<1x256xf32, #tpu.memory_space<vmem>>, vector<1x256xf32>
      %cst_9 = arith.constant 9.765625E-4 : f32
      %13 = vector.broadcast %cst_9 : f32 to vector<1x256xf32>
      %14 = arith.mulf %12, %13 : vector<1x256xf32>
      %c0_10 = arith.constant 0 : index
      %c0_11 = arith.constant 0 : index
      %15 = vector.load %arg2[%c0_10, %c0_11] : memref<1x256xf32, #tpu.memory_space<vmem>>, vector<1x256xf32>
      tpu.vector_store %arg2[%c0_10, %c0_11], %14 {strides = array<i32>} : memref<1x256xf32, #tpu.memory_space<vmem>>, vector<1x256xf32>,
    } else {
    }
    return
  }
  func.func @transform_0(%arg0: i32) -> (i32, i32) {
    %c0_i32 = arith.constant 0 : i32
    %c0_i32_0 = arith.constant 0 : i32
    return %arg0, %c0_i32 : i32, i32
  }
  func.func @transform_1(%arg0: i32) -> (i32, i32) {
    %c0_i32 = arith.constant 0 : i32
    %c0_i32_0 = arith.constant 0 : i32
    %c0_i32_1 = arith.constant 0 : i32
    return %c0_i32, %c0_i32_0 : i32, i32
  }
}

</mosaic_0001>

<bundles_post_ra>
// kernel: tpu_custom_call.1
= control target key start
LH: loop header
LB: loop body
LE: loop exit
PB: predicated region body
PF: predicated region fallthrough
CT: control target
= control target key end

     0   :  { %6 = vsyncpa [#allocation3], 0  ;;  %s926_s0 = inlined_call_operand.hbm [shape: f32[1024,256], index: 0, kind: input, shape index: {}]   ;;  %s927_s1 = inlined_call_operand.hbm [shape: f32[1,256], index: 1, kind: output, shape index: {}]  }
   0x1   :  { %8 = vsyncpa [#allocation3 + $0x1], 0 }
   0x2   :  { %9 = vsyncpa [#allocation4], 0  ;;  %s668_s6 = smov 0   ;;  %s670_s7 = smov 0  }
   0x3   :  { %s672_s8 = smov 0   ;;  %s674_s9 = smov 0  }
   0x4 LB: > { %s687_s10 = sadd.s32 4294967295, %s650_s9   ;;  %s690_s11 = sadd.s32 1, %s650_s9   ;;  %s650_s9 = sphi %s674_s9, %s934_s9   ;;  %s646_s8 = sphi %s672_s8, %s933_s8   ;;  %s642_s7 = sphi %s670_s7, %s932_s7   ;;  %s638_s6 = sphi %s668_s6, %s931_s6  }
   0x5   : > { %s19_s12 = ssub.s32 %s650_s9, %s690_s11  ;;  %s22_s13 = sadd.s32 1, %s646_s8 }
   0x6   : > { %p20_p0 = scmp.eq.s32.totalorder %s19_s12, 0  ;;  %p29_p1 = scmp.ne.s32.totalorder %s646_s8, %s642_s7 }
   0x7   : > { %p30_p2 = scmp.eq.s32.totalorder %s650_s9, 0  ;;  %p35_p3 = scmp.ne.s32.totalorder %s642_s7, %s638_s6 }
   0x8   : > { %s700_s14 = scalar_select %p20_p0, %s646_s8, %s22_s13  }
   0x9   : > { %p31_p4 = por %p30_p2, %p29_p1  ;;  %p36_p5 = scmp.eq.s32.totalorder %s687_s10, 0 }
   0xa   : > { %p516_p6 = scmp.lt.s32.totalorder %s650_s9, 2  ;;  %s80_s16 = sand.u32 1, %s646_s8  }
   0xb   : > { %p704_p7 = por %p36_p5, %p35_p3  ;;  %s492_s17 = sshll.u32 %s80_s16, 10 }
   0xc   : > { %s505_s18 = sshll.u32 %s650_s9, 14  ;;  %s84_s22 = scalar_lea.vmem [#allocation2], %s492_s17 }
   0xd   : > { %s713_s21 = scalar_lea.hbm %s926_s0, %s505_s18  ;;  %s92_s23 = sshll.u32 %s84_s22, 4  ;;  %s715_s23 = int_to_ptr.vmem [resolvable:$true] %s92_s23 }
   0xe   : > { %p717_p8 = pnand %p516_p6, %p31_p4  ;;  %s722_s25 = scalar_lea.sflag [#allocation3], %s80_s16 }
   0xf   : > { %s556_s26 = scalar_lea.hbm %s713_s21, 16384  ;;  %s561_s29 = scalar_lea.hbm %s926_s0, 32768 }
  0x10   : > { %p557_p10 = scmp.ne.s32.totalorder %s713_s21, %s556_s26  ;;  %p558_p11 = pneg %p717_p8 }
  0x11   : > { %p562_p0 = scmp.lt.u32.totalorder %s713_s21, %s926_s0  ;;  %p563_p1 = scmp.lt.u32.totalorder %s561_s29, %s556_s26 }
  0x12   : > { %p559_p12 = pnand %p558_p11, %p557_p10  ;;  %p565_p3 = scmp.lt.u32.totalorder %s556_s26, %s713_s21 }
  0x13   : > { %p564_p2 = por %p563_p1, %p562_p0 }
  0x14   : > { %p560_p13 = pneg %p559_p12 }
  0x15   : > { %p566_p4 = por %p565_p3, %p564_p2 }
  0x17   : > { %p567_p5 = pnand %p566_p4, %p560_p13 }
  0x19   : > { %570 = shalt.err (!%p567_p5)
}
  0x1a   : > { %s571_s3 = scalar_lea.vmem %s715_s23, 16384  ;;  %s652_s4 = smov [#allocation2]  }
  0x1b   : > { %p572_p6 = scmp.ne.s32.totalorder %s715_s23, %s571_s3  ;;  %s576_s5 = sshll.u32 %s652_s4, 4  ;;  %s577_s5 = int_to_ptr.vmem [resolvable:$false] %s576_s5 }
  0x1c   : > { %s578_s6 = scalar_lea.vmem %s577_s5, 32768  ;;  %p579_p9 = scmp.lt.s32.totalorder %s715_s23, %s577_s5 }
  0x1d   : > { %p574_p10 = pnand %p572_p6, %p558_p11  ;;  %p580_p0 = scmp.lt.s32.totalorder %s578_s6, %s571_s3 }
  0x1f   : > { %p575_p12 = pneg %p574_p10  ;;  %p581_p1 = por %p580_p0, %p579_p9 }
  0x21   : > { %p582_p2 = pnand %p581_p1, %p575_p12 }
  0x23   : > { %585 = shalt.err (!%p582_p2)
}
  0x24   : > { %s653_s12 = smov 256   ;;  %s654_s13 = smov 16  }
  0x25   : > { %515 = dma.hbm_to_vmem [thread:$0]  (!%p717_p8), %s713_s21, 16384, %s715_s23, %s722_s25, %s653_s12, %s653_s12, %s654_s13  }
  0x26   : > { %p100_p11 = scmp.lt.s32.totalorder %s650_s9, 3  ;;  %p930_p13 = scmp.ge.s32.totalorder %s650_s9, 1 }
  0x28   : > { %p101_p3 = pnand %p930_p13, %p100_p11 }
  0x29   : > { %s106_s16 = sand.u32 (!%p101_p3), 1, %s642_s7  }
  0x2a   : > { %104 = sbr.rel (%p101_p3) target bundleno = 243 (0xf3), region = 24  ;;  %s497_s17 = sshll.u32 (!%p101_p3), %s106_s16, 10 }
  0x2b   : > { %s107_s18 = scalar_lea.sflag (!%p101_p3), [#allocation3], %s106_s16  ;;  %s754_s19 = scalar_lea.vmem (!%p101_p3), [#allocation2], %s497_s17 }
  0x31   : > { %629 = dma.done.wait (%p704_p7), %s107_s18, 16384  }
  0x32   : > { %631 = vsyncadd (%p704_p7), %s107_s18, 4294950912  ;;  %p498_p9 = scmp.ne.s32.totalorder %s687_s10, 0 }
  0x33   : > { %v129_v0 = vlaneseq (!%p498_p9)  ;;  %v655_v1 = vmov (!%p498_p9), 0.0  }
  0x34   : > { %128 = sbr.rel (%p498_p9) target bundleno = 59 (0x3b), region = 32 }
  0x35   : > { %vm131_vm0 = vcmp.lt.s32.totalorder (!%p498_p9), %v129_v0, 256 }
  0x36   : > { %133 = vst.msk [vmem:[#allocation5] sm:$0x3] (!%p498_p9), %vm131_vm0, %v655_v1 }
  0x3b PF: > { %v134_v2 = vld [vmem:[%s754_s19] sm:$0xff]  ;;  %v135_v3 = vld [vmem:[%s754_s19 + $0x8] sm:$0xff]  ;;  %v136_v4 = vld [vmem:[%s754_s19 + $0x10] sm:$0xff]  ;;  %p499_p7 = scmp.ne.s32.totalorder %s687_s10, 1 }
  0x3c   : > { %v137_v5 = vld [vmem:[%s754_s19 + $0x18] sm:$0xff]  ;;  %v138_v6 = vld [vmem:[%s754_s19 + $0x20] sm:$0xff]  ;;  %v139_v7 = vld [vmem:[%s754_s19 + $0x28] sm:$0xff]  ;;  %v263_v8 = vadd.f32 %v136_v4, %v134_v2 }
  0x3d   : > { %v140_v9 = vld [vmem:[%s754_s19 + $0x30] sm:$0xff]  ;;  %v332_v10 = vadd.f32 %v137_v5, %v135_v3  ;;  %v141_v11 = vld [vmem:[%s754_s19 + $0x38] sm:$0xff]  ;;  %v142_v13 = vld [vmem:[%s754_s19 + $0x40] sm:$0xff] }
  0x3e   : > { %v264_v12 = vadd.f32 %v263_v8, %v138_v6  ;;  %v143_v15 = vld [vmem:[%s754_s19 + $0x48] sm:$0xff]  ;;  %v144_v17 = vld [vmem:[%s754_s19 + $0x50] sm:$0xff]  ;;  %v145_v19 = vld [vmem:[%s754_s19 + $0x58] sm:$0xff] }
  0x3f   : > { %v333_v14 = vadd.f32 %v332_v10, %v139_v7  ;;  %v146_v21 = vld [vmem:[%s754_s19 + $0x60] sm:$0xff]  ;;  %v147_v23 = vld [vmem:[%s754_s19 + $0x68] sm:$0xff]  ;;  %v148_v25 = vld [vmem:[%s754_s19 + $0x70] sm:$0xff] }
  0x40   : > { %v265_v16 = vadd.f32 %v264_v12, %v140_v9  ;;  %v149_v27 = vld [vmem:[%s754_s19 + $0x78] sm:$0xff]  ;;  %v150_v29 = vld [vmem:[%s754_s19 + $0x80] sm:$0xff]  ;;  %v151_v31 = vld [vmem:[%s754_s19 + $0x88] sm:$0xff] }
  0x41   : > { %v334_v18 = vadd.f32 %v333_v14, %v141_v11  ;;  %v152_v33 = vld [vmem:[%s754_s19 + $0x90] sm:$0xff]  ;;  %v153_v35 = vld [vmem:[%s754_s19 + $0x98] sm:$0xff]  ;;  %v154_v37 = vld [vmem:[%s754_s19 + $0xa0] sm:$0xff] }
  0x42   : > { %v266_v20 = vadd.f32 %v265_v16, %v142_v13  ;;  %v155_v39 = vld [vmem:[%s754_s19 + $0xa8] sm:$0xff]  ;;  %v156_v41 = vld [vmem:[%s754_s19 + $0xb0] sm:$0xff]  ;;  %v157_v43 = vld [vmem:[%s754_s19 + $0xb8] sm:$0xff] }
  0x43   : > { %v335_v22 = vadd.f32 %v334_v18, %v143_v15  ;;  %v158_v45 = vld [vmem:[%s754_s19 + $0xc0] sm:$0xff]  ;;  %v159_v47 = vld [vmem:[%s754_s19 + $0xc8] sm:$0xff]  ;;  %v160_v49 = vld [vmem:[%s754_s19 + $0xd0] sm:$0xff] }
  0x44   : > { %v267_v24 = vadd.f32 %v266_v20, %v144_v17  ;;  %v161_v51 = vld [vmem:[%s754_s19 + $0xd8] sm:$0xff]  ;;  %v162_v53 = vld [vmem:[%s754_s19 + $0xe0] sm:$0xff]  ;;  %v163_v55 = vld [vmem:[%s754_s19 + $0xe8] sm:$0xff] }
  0x45   : > { %v336_v26 = vadd.f32 %v335_v22, %v145_v19  ;;  %v164_v57 = vld [vmem:[%s754_s19 + $0xf0] sm:$0xff]  ;;  %v165_v59 = vld [vmem:[%s754_s19 + $0xf8] sm:$0xff]  ;;  %v166_v61 = vld [vmem:[%s754_s19 + $0x100] sm:$0xff] }
  0x46   : > { %v268_v28 = vadd.f32 %v267_v24, %v146_v21  ;;  %v167_v63 = vld [vmem:[%s754_s19 + $0x108] sm:$0xff]  ;;  %v168_v1 = vld [vmem:[%s754_s19 + $0x110] sm:$0xff]  ;;  %v169_v3 = vld [vmem:[%s754_s19 + $0x118] sm:$0xff] }
  0x47   : > { %v337_v30 = vadd.f32 %v336_v26, %v147_v23  ;;  %v170_v5 = vld [vmem:[%s754_s19 + $0x120] sm:$0xff]  ;;  %v171_v7 = vld [vmem:[%s754_s19 + $0x128] sm:$0xff]  ;;  %v172_v9 = vld [vmem:[%s754_s19 + $0x130] sm:$0xff] }
  0x48   : > { %v269_v32 = vadd.f32 %v268_v28, %v148_v25  ;;  %v173_v11 = vld [vmem:[%s754_s19 + $0x138] sm:$0xff]  ;;  %v174_v13 = vld [vmem:[%s754_s19 + $0x140] sm:$0xff]  ;;  %v175_v15 = vld [vmem:[%s754_s19 + $0x148] sm:$0xff] }
  0x49   : > { %v338_v34 = vadd.f32 %v337_v30, %v149_v27  ;;  %v176_v17 = vld [vmem:[%s754_s19 + $0x150] sm:$0xff]  ;;  %v177_v19 = vld [vmem:[%s754_s19 + $0x158] sm:$0xff]  ;;  %v178_v21 = vld [vmem:[%s754_s19 + $0x160] sm:$0xff] }
  0x4a   : > { %v270_v36 = vadd.f32 %v269_v32, %v150_v29  ;;  %v179_v23 = vld [vmem:[%s754_s19 + $0x168] sm:$0xff]  ;;  %v180_v25 = vld [vmem:[%s754_s19 + $0x170] sm:$0xff]  ;;  %v181_v27 = vld [vmem:[%s754_s19 + $0x178] sm:$0xff] }
  0x4b   : > { %v339_v38 = vadd.f32 %v338_v34, %v151_v31  ;;  %v182_v29 = vld [vmem:[%s754_s19 + $0x180] sm:$0xff]  ;;  %v183_v31 = vld [vmem:[%s754_s19 + $0x188] sm:$0xff] }
  0x4c   : > { %v271_v40 = vadd.f32 %v270_v36, %v152_v33  ;;  %v184_v33 = vld [vmem:[%s754_s19 + $0x190] sm:$0xff] }
  0x4d   : > { %v340_v42 = vadd.f32 %v339_v38, %v153_v35  ;;  %v185_v35 = vld [vmem:[%s754_s19 + $0x198] sm:$0xff] }
  0x4e   : > { %v272_v44 = vadd.f32 %v271_v40, %v154_v37  ;;  %v186_v37 = vld [vmem:[%s754_s19 + $0x1a0] sm:$0xff] }
  0x4f   : > { %v341_v46 = vadd.f32 %v340_v42, %v155_v39  ;;  %v187_v39 = vld [vmem:[%s754_s19 + $0x1a8] sm:$0xff] }
  0x50   : > { %v273_v48 = vadd.f32 %v272_v44, %v156_v41  ;;  %v188_v41 = vld [vmem:[%s754_s19 + $0x1b0] sm:$0xff] }
  0x51   : > { %v342_v50 = vadd.f32 %v341_v46, %v157_v43  ;;  %v189_v43 = vld [vmem:[%s754_s19 + $0x1b8] sm:$0xff] }
  0x52   : > { %v274_v52 = vadd.f32 %v273_v48, %v158_v45  ;;  %v190_v45 = vld [vmem:[%s754_s19 + $0x1c0] sm:$0xff] }
  0x53   : > { %v343_v54 = vadd.f32 %v342_v50, %v159_v47  ;;  %v191_v47 = vld [vmem:[%s754_s19 + $0x1c8] sm:$0xff] }
  0x54   : > { %v275_v56 = vadd.f32 %v274_v52, %v160_v49  ;;  %v192_v49 = vld [vmem:[%s754_s19 + $0x1d0] sm:$0xff] }
  0x55   : > { %v344_v58 = vadd.f32 %v343_v54, %v161_v51  ;;  %v193_v51 = vld [vmem:[%s754_s19 + $0x1d8] sm:$0xff] }
  0x56   : > { %v276_v60 = vadd.f32 %v275_v56, %v162_v53  ;;  %v194_v53 = vld [vmem:[%s754_s19 + $0x1e0] sm:$0xff] }
  0x57   : > { %v345_v62 = vadd.f32 %v344_v58, %v163_v55  ;;  %v195_v55 = vld [vmem:[%s754_s19 + $0x1e8] sm:$0xff] }
  0x58   : > { %v277_v0 = vadd.f32 %v276_v60, %v164_v57  ;;  %v196_v57 = vld [vmem:[%s754_s19 + $0x1f0] sm:$0xff] }
  0x59   : > { %v346_v2 = vadd.f32 %v345_v62, %v165_v59  ;;  %v197_v59 = vld [vmem:[%s754_s19 + $0x1f8] sm:$0xff] }
  0x5a   : > { %v278_v4 = vadd.f32 %v277_v0, %v166_v61  ;;  %v198_v61 = vld [vmem:[%s754_s19 + $0x200] sm:$0xff] }
  0x5b   : > { %v347_v6 = vadd.f32 %v346_v2, %v167_v63  ;;  %v199_v63 = vld [vmem:[%s754_s19 + $0x208] sm:$0xff] }
  0x5c   : > { %v279_v8 = vadd.f32 %v278_v4, %v168_v1  ;;  %v200_v1 = vld [vmem:[%s754_s19 + $0x210] sm:$0xff] }
  0x5d   : > { %v348_v10 = vadd.f32 %v347_v6, %v169_v3  ;;  %v201_v3 = vld [vmem:[%s754_s19 + $0x218] sm:$0xff] }
  0x5e   : > { %v280_v12 = vadd.f32 %v279_v8, %v170_v5  ;;  %v202_v5 = vld [vmem:[%s754_s19 + $0x220] sm:$0xff] }
  0x5f   : > { %v349_v14 = vadd.f32 %v348_v10, %v171_v7  ;;  %v203_v7 = vld [vmem:[%s754_s19 + $0x228] sm:$0xff] }
  0x60   : > { %v281_v16 = vadd.f32 %v280_v12, %v172_v9  ;;  %v204_v9 = vld [vmem:[%s754_s19 + $0x230] sm:$0xff] }
  0x61   : > { %v350_v18 = vadd.f32 %v349_v14, %v173_v11  ;;  %v205_v11 = vld [vmem:[%s754_s19 + $0x238] sm:$0xff] }
  0x62   : > { %v282_v20 = vadd.f32 %v281_v16, %v174_v13  ;;  %v206_v13 = vld [vmem:[%s754_s19 + $0x240] sm:$0xff] }
  0x63   : > { %v351_v22 = vadd.f32 %v350_v18, %v175_v15  ;;  %v207_v15 = vld [vmem:[%s754_s19 + $0x248] sm:$0xff] }
  0x64   : > { %v283_v24 = vadd.f32 %v282_v20, %v176_v17  ;;  %v208_v17 = vld [vmem:[%s754_s19 + $0x250] sm:$0xff] }
  0x65   : > { %v352_v26 = vadd.f32 %v351_v22, %v177_v19  ;;  %v209_v19 = vld [vmem:[%s754_s19 + $0x258] sm:$0xff] }
  0x66   : > { %v284_v28 = vadd.f32 %v283_v24, %v178_v21  ;;  %v210_v21 = vld [vmem:[%s754_s19 + $0x260] sm:$0xff] }
  0x67   : > { %v353_v30 = vadd.f32 %v352_v26, %v179_v23  ;;  %v211_v23 = vld [vmem:[%s754_s19 + $0x268] sm:$0xff] }
  0x68   : > { %v285_v32 = vadd.f32 %v284_v28, %v180_v25  ;;  %v212_v25 = vld [vmem:[%s754_s19 + $0x270] sm:$0xff] }
  0x69   : > { %v354_v34 = vadd.f32 %v353_v30, %v181_v27  ;;  %v213_v27 = vld [vmem:[%s754_s19 + $0x278] sm:$0xff] }
  0x6a   : > { %v286_v36 = vadd.f32 %v285_v32, %v182_v29  ;;  %v214_v29 = vld [vmem:[%s754_s19 + $0x280] sm:$0xff] }
  0x6b   : > { %v355_v38 = vadd.f32 %v354_v34, %v183_v31  ;;  %v215_v31 = vld [vmem:[%s754_s19 + $0x288] sm:$0xff] }
  0x6c   : > { %v287_v40 = vadd.f32 %v286_v36, %v184_v33  ;;  %v216_v33 = vld [vmem:[%s754_s19 + $0x290] sm:$0xff] }
  0x6d   : > { %v356_v42 = vadd.f32 %v355_v38, %v185_v35  ;;  %v217_v35 = vld [vmem:[%s754_s19 + $0x298] sm:$0xff] }
  0x6e   : > { %v288_v44 = vadd.f32 %v287_v40, %v186_v37  ;;  %v218_v37 = vld [vmem:[%s754_s19 + $0x2a0] sm:$0xff] }
  0x6f   : > { %v357_v46 = vadd.f32 %v356_v42, %v187_v39  ;;  %v219_v39 = vld [vmem:[%s754_s19 + $0x2a8] sm:$0xff] }
  0x70   : > { %v289_v48 = vadd.f32 %v288_v44, %v188_v41  ;;  %v220_v41 = vld [vmem:[%s754_s19 + $0x2b0] sm:$0xff] }
  0x71   : > { %v358_v50 = vadd.f32 %v357_v46, %v189_v43  ;;  %v221_v43 = vld [vmem:[%s754_s19 + $0x2b8] sm:$0xff] }
  0x72   : > { %v290_v52 = vadd.f32 %v289_v48, %v190_v45  ;;  %v222_v45 = vld [vmem:[%s754_s19 + $0x2c0] sm:$0xff] }
  0x73   : > { %v359_v54 = vadd.f32 %v358_v50, %v191_v47  ;;  %v223_v47 = vld [vmem:[%s754_s19 + $0x2c8] sm:$0xff] }
  0x74   : > { %v291_v56 = vadd.f32 %v290_v52, %v192_v49  ;;  %v224_v49 = vld [vmem:[%s754_s19 + $0x2d0] sm:$0xff] }
  0x75   : > { %v360_v58 = vadd.f32 %v359_v54, %v193_v51  ;;  %v225_v51 = vld [vmem:[%s754_s19 + $0x2d8] sm:$0xff] }
  0x76   : > { %v292_v60 = vadd.f32 %v291_v56, %v194_v53  ;;  %v226_v53 = vld [vmem:[%s754_s19 + $0x2e0] sm:$0xff] }
  0x77   : > { %v361_v62 = vadd.f32 %v360_v58, %v195_v55  ;;  %v227_v55 = vld [vmem:[%s754_s19 + $0x2e8] sm:$0xff] }
  0x78   : > { %v293_v0 = vadd.f32 %v292_v60, %v196_v57  ;;  %v228_v57 = vld [vmem:[%s754_s19 + $0x2f0] sm:$0xff] }
  0x79   : > { %v362_v2 = vadd.f32 %v361_v62, %v197_v59  ;;  %v229_v59 = vld [vmem:[%s754_s19 + $0x2f8] sm:$0xff] }
  0x7a   : > { %v294_v4 = vadd.f32 %v293_v0, %v198_v61  ;;  %v230_v61 = vld [vmem:[%s754_s19 + $0x300] sm:$0xff] }
  0x7b   : > { %v363_v6 = vadd.f32 %v362_v2, %v199_v63  ;;  %v231_v63 = vld [vmem:[%s754_s19 + $0x308] sm:$0xff] }
  0x7c   : > { %v295_v8 = vadd.f32 %v294_v4, %v200_v1  ;;  %v232_v1 = vld [vmem:[%s754_s19 + $0x310] sm:$0xff] }
  0x7d   : > { %v364_v10 = vadd.f32 %v363_v6, %v201_v3  ;;  %v233_v3 = vld [vmem:[%s754_s19 + $0x318] sm:$0xff] }
  0x7e   : > { %v296_v12 = vadd.f32 %v295_v8, %v202_v5  ;;  %v234_v5 = vld [vmem:[%s754_s19 + $0x320] sm:$0xff] }
  0x7f   : > { %v365_v14 = vadd.f32 %v364_v10, %v203_v7  ;;  %v235_v7 = vld [vmem:[%s754_s19 + $0x328] sm:$0xff] }
  0x80   : > { %v297_v16 = vadd.f32 %v296_v12, %v204_v9  ;;  %v236_v9 = vld [vmem:[%s754_s19 + $0x330] sm:$0xff] }
  0x81   : > { %v366_v18 = vadd.f32 %v365_v14, %v205_v11  ;;  %v237_v11 = vld [vmem:[%s754_s19 + $0x338] sm:$0xff] }
  0x82   : > { %v298_v20 = vadd.f32 %v297_v16, %v206_v13  ;;  %v238_v13 = vld [vmem:[%s754_s19 + $0x340] sm:$0xff] }
  0x83   : > { %v367_v22 = vadd.f32 %v366_v18, %v207_v15  ;;  %v239_v15 = vld [vmem:[%s754_s19 + $0x348] sm:$0xff] }
  0x84   : > { %v299_v24 = vadd.f32 %v298_v20, %v208_v17  ;;  %v240_v17 = vld [vmem:[%s754_s19 + $0x350] sm:$0xff] }
  0x85   : > { %v368_v26 = vadd.f32 %v367_v22, %v209_v19  ;;  %v241_v19 = vld [vmem:[%s754_s19 + $0x358] sm:$0xff] }
  0x86   : > { %v300_v28 = vadd.f32 %v299_v24, %v210_v21  ;;  %v242_v21 = vld [vmem:[%s754_s19 + $0x360] sm:$0xff] }
  0x87   : > { %v369_v30 = vadd.f32 %v368_v26, %v211_v23  ;;  %v243_v23 = vld [vmem:[%s754_s19 + $0x368] sm:$0xff] }
  0x88   : > { %v301_v32 = vadd.f32 %v300_v28, %v212_v25  ;;  %v244_v25 = vld [vmem:[%s754_s19 + $0x370] sm:$0xff] }
  0x89   : > { %v370_v34 = vadd.f32 %v369_v30, %v213_v27  ;;  %v245_v27 = vld [vmem:[%s754_s19 + $0x378] sm:$0xff] }
  0x8a   : > { %v302_v36 = vadd.f32 %v301_v32, %v214_v29  ;;  %v246_v29 = vld [vmem:[%s754_s19 + $0x380] sm:$0xff] }
  0x8b   : > { %v371_v38 = vadd.f32 %v370_v34, %v215_v31  ;;  %v247_v31 = vld [vmem:[%s754_s19 + $0x388] sm:$0xff] }
  0x8c   : > { %v303_v40 = vadd.f32 %v302_v36, %v216_v33  ;;  %v248_v33 = vld [vmem:[%s754_s19 + $0x390] sm:$0xff] }
  0x8d   : > { %v372_v42 = vadd.f32 %v371_v38, %v217_v35  ;;  %v249_v35 = vld [vmem:[%s754_s19 + $0x398] sm:$0xff] }
  0x8e   : > { %v304_v44 = vadd.f32 %v303_v40, %v218_v37  ;;  %v250_v37 = vld [vmem:[%s754_s19 + $0x3a0] sm:$0xff] }
  0x8f   : > { %v373_v46 = vadd.f32 %v372_v42, %v219_v39  ;;  %v251_v39 = vld [vmem:[%s754_s19 + $0x3a8] sm:$0xff] }
  0x90   : > { %v305_v48 = vadd.f32 %v304_v44, %v220_v41  ;;  %v252_v41 = vld [vmem:[%s754_s19 + $0x3b0] sm:$0xff] }
  0x91   : > { %v374_v50 = vadd.f32 %v373_v46, %v221_v43  ;;  %v253_v43 = vld [vmem:[%s754_s19 + $0x3b8] sm:$0xff] }
  0x92   : > { %v306_v52 = vadd.f32 %v305_v48, %v222_v45  ;;  %v254_v45 = vld [vmem:[%s754_s19 + $0x3c0] sm:$0xff] }
  0x93   : > { %v375_v54 = vadd.f32 %v374_v50, %v223_v47  ;;  %v255_v47 = vld [vmem:[%s754_s19 + $0x3c8] sm:$0xff] }
  0x94   : > { %v307_v56 = vadd.f32 %v306_v52, %v224_v49  ;;  %v256_v49 = vld [vmem:[%s754_s19 + $0x3d0] sm:$0xff] }
  0x95   : > { %v376_v58 = vadd.f32 %v375_v54, %v225_v51  ;;  %v257_v51 = vld [vmem:[%s754_s19 + $0x3d8] sm:$0xff] }
  0x96   : > { %v308_v60 = vadd.f32 %v307_v56, %v226_v53  ;;  %v258_v53 = vld [vmem:[%s754_s19 + $0x3e0] sm:$0xff] }
  0x97   : > { %v377_v62 = vadd.f32 %v376_v58, %v227_v55  ;;  %v259_v55 = vld [vmem:[%s754_s19 + $0x3e8] sm:$0xff] }
  0x98   : > { %v309_v0 = vadd.f32 %v308_v60, %v228_v57  ;;  %v260_v57 = vld [vmem:[%s754_s19 + $0x3f0] sm:$0xff] }
  0x99   : > { %v378_v2 = vadd.f32 %v377_v62, %v229_v59  ;;  %v261_v59 = vld [vmem:[%s754_s19 + $0x3f8] sm:$0xff] }
  0x9a   : > { %v310_v4 = vadd.f32 %v309_v0, %v230_v61 }
  0x9b   : > { %v379_v6 = vadd.f32 %v378_v2, %v231_v63 }
  0x9c   : > { %v311_v8 = vadd.f32 %v310_v4, %v232_v1  ;;  %v656_v4 = vmov 1966171168  }
  0x9d   : > { %v380_v10 = vadd.f32 %v379_v6, %v233_v3  ;;  %v407_v6 = vlaneseq }
  0x9e   : > { %v312_v12 = vadd.f32 %v311_v8, %v234_v5  ;;  %v405_v5 = vunpack.c.l.s4 %v656_v4 }
  0x9f   : > { %v381_v14 = vadd.f32 %v380_v10, %v235_v7  ;;  %vm422_vm1 = vcmp.lt.s32.totalorder %v407_v6, 256 }
  0xa0   : > { %v313_v16 = vadd.f32 %v312_v12, %v236_v9  ;;  %v408_v12 = vshrl.u32 %v407_v6, 7 }
  0xa1   : > { %v382_v18 = vadd.f32 %v381_v14, %v237_v11  ;;  %v406_v11 = vunpack.c.0.s8 %v405_v5 }
  0xa2   : > { %v314_v20 = vadd.f32 %v313_v16, %v238_v13 }
  0xa3   : > { %v383_v22 = vadd.f32 %v382_v18, %v239_v15 }
  0xa4   : > { %v315_v24 = vadd.f32 %v314_v20, %v240_v17  ;;  %v409_v17 = vsub.s32 %v406_v11, %v408_v12  ;;  %v262_v20 = vld [vmem:[#allocation5] sm:$0x3] }
  0xa5   : > { %v384_v26 = vadd.f32 %v383_v22, %v241_v19 }
  0xa6   : > { %v316_v28 = vadd.f32 %v315_v24, %v242_v21 }
  0xa7   : > { %v385_v30 = vadd.f32 %v384_v26, %v243_v23 }
  0xa8   : > { %v317_v32 = vadd.f32 %v316_v28, %v244_v25 }
  0xa9   : > { %v386_v34 = vadd.f32 %v385_v30, %v245_v27 }
  0xaa   : > { %v318_v36 = vadd.f32 %v317_v32, %v246_v29 }
  0xab   : > { %v387_v38 = vadd.f32 %v386_v34, %v247_v31 }
  0xac   : > { %v319_v40 = vadd.f32 %v318_v36, %v248_v33 }
  0xad   : > { %v388_v42 = vadd.f32 %v387_v38, %v249_v35 }
  0xae   : > { %v320_v44 = vadd.f32 %v319_v40, %v250_v37 }
  0xaf   : > { %v389_v46 = vadd.f32 %v388_v42, %v251_v39 }
  0xb0   : > { %v321_v48 = vadd.f32 %v320_v44, %v252_v41 }
  0xb1   : > { %v390_v50 = vadd.f32 %v389_v46, %v253_v43 }
  0xb2   : > { %v322_v52 = vadd.f32 %v321_v48, %v254_v45 }
  0xb3   : > { %v391_v54 = vadd.f32 %v390_v50, %v255_v47 }
  0xb4   : > { %v323_v56 = vadd.f32 %v322_v52, %v256_v49 }
  0xb5   : > { %v392_v58 = vadd.f32 %v391_v54, %v257_v51 }
  0xb6   : > { %v324_v60 = vadd.f32 %v323_v56, %v258_v53 }
  0xb7   : > { %v393_v61 = vadd.f32 %v392_v58, %v259_v55 }
  0xb8   : > { %v325_v62 = vadd.f32 %v324_v60, %v260_v57 }
  0xb9   : > { %v394_v63 = vadd.f32 %v393_v61, %v261_v59 }
  0xba   : > { %v326_v0 = vrot.slane %v325_v62, 4 }
  0xbb   : > { %v395_v1 = vrot.slane %v394_v63, 4 }
  0xbc   : > { %v327_v2 = vadd.f32 %v326_v0, %v325_v62 }
  0xbd   : > { %v396_v3 = vadd.f32 %v395_v1, %v394_v63 }
  0xbe   : > { %v328_v7 = vrot.slane %v327_v2, 2 }
  0xbf   : > { %v397_v8 = vrot.slane %v396_v3, 2 }
  0xc0   : > { %v329_v9 = vadd.f32 %v328_v7, %v327_v2 }
  0xc1   : > { %v398_v10 = vadd.f32 %v397_v8, %v396_v3 }
  0xc2   : > { %v330_v13 = vrot.slane %v329_v9, 1 }
  0xc3   : > { %v399_v14 = vrot.slane %v398_v10, 1 }
  0xc4   : > { %v331_v15 = vadd.f32 %v330_v13, %v329_v9 }
  0xc5   : > { %v400_v16 = vadd.f32 %v399_v14, %v398_v10 }
  0xc7   : > { %v403_v18 = vcombine.low %v331_v15, %v400_v16 }
  0xc9   : > { %v410_v19 = vrot.slane %v403_v18, %v409_v17  ;;  %428 = sbr.rel (%p499_p7) target bundleno = 218 (0xda), region = 36 }
  0xcb   : > { %v417_v21 = vrot.slane %v410_v19, %v409_v17 }
  0xcd   : > { %v419_v22 = vadd.f32 %v417_v21, %v262_v20 }
  0xcf   : > { %424 = vst.msk [vmem:[#allocation5] sm:$0x3] %vm422_vm1, %v419_v22 }
  0xd6   : > { %v429_v23 = vld [vmem:[#allocation5] sm:$0x3] }
  0xd7   : > { %v430_v24 = vmul.f32 0.0009765625, %v429_v23 }
  0xd9   : > { %431 = vst.msk [vmem:[#allocation5] sm:$0x3] %vm422_vm1, %v430_v24 }
  0xda PF: > { %p517_p8 = scmp.eq.s32.totalorder %s687_s10, 1  ;;  %s657_s9 = smov [#allocation5]  }
  0xdb   : > { %s439_s15 = sshll.u32 %s657_s9, 4  ;;  %s440_s15 = int_to_ptr.vmem [resolvable:$true] %s439_s15 }
  0xdc   : > { %s586_s20 = scalar_lea.vmem %s440_s15, 32  ;;  %p593_p10 = scmp.lt.s32.totalorder %s440_s15, %s440_s15 }
  0xdd   : > { %p587_p4 = scmp.ne.s32.totalorder %s440_s15, %s586_s20  ;;  %p594_p12 = scmp.lt.s32.totalorder %s586_s20, %s586_s20 }
  0xdf   : > { %p588_p5 = pnand %p587_p4, %p517_p8  ;;  %p595_p0 = por %p594_p12, %p593_p10 }
  0xe1   : > { %p589_p6 = pneg %p588_p5 }
  0xe3   : > { %p596_p1 = pnand %p595_p0, %p589_p6 }
  0xe5   : > { %599 = shalt.err (!%p596_p1)
}
  0xe6   : > { %s600_s23 = scalar_lea.hbm %s927_s1, 32 }
  0xe7   : > { %p601_p2 = scmp.ne.s32.totalorder %s927_s1, %s600_s23  ;;  %p606_p3 = scmp.lt.u32.totalorder %s600_s23, %s927_s1 }
  0xe9   : > { %p602_p11 = pnand %p601_p2, %p517_p8 }
  0xeb   : > { %p603_p13 = pneg %p602_p11 }
  0xed   : > { %p608_p9 = pnand %p606_p3, %p603_p13 }
  0xef   : > { %611 = shalt.err (!%p608_p9)
}
  0xf0   : > { %509 = dma.vmem_to_hbm [thread:$0]  (%p517_p8), %s440_s15, 32, %s927_s1, [#allocation4]  }
  0xf1   : > { %633 = dma.done.wait (%p517_p8), [#allocation4], 32  }
  0xf2   : > { %635 = vsyncadd (%p517_p8), [#allocation4], 4294967264 }
  0xf3 PF: > { %p12_p7 = scmp.ge.s32.totalorder %s690_s11, 4   ;;  %s931_s6 = smov %s642_s7 }
  0xf4   : > { %s932_s7 = smov %s646_s8  ;;  %s933_s8 = smov %s700_s14 }
  0xf5   : > { %s934_s9 = smov %s690_s11  ;;  %14 = sbr.rel (!%p12_p7) target bundleno = 4 (0x4), region = 69 }
  0xfc   :  { %452 = vsyncpa [#allocation3], 1 }
  0xfd   :  { %454 = vsyncpa [#allocation3 + $0x1], 1 }
  0xfe   :  { %455 = vsyncpa [#allocation4], 1 }
  0xff   :  { %457 = vsyncpa [#allocation4 + $0x1], 1 }

</bundles_post_ra>
